<compile_context>
chip_gen: v7x
topology: tpu7x:2x2x1
jax: 0.10.0
libtpu: 0.0.40
codegen_flags: <defaults>
</compile_context>

<pallas_src>
import jax
import jax.numpy as jnp
from jax.experimental import pallas as pl
from jax.experimental.pallas import tpu as pltpu


def mlp_kernel(x_ref, wmid_ref, sp_ref, o_ref):
    """x_ref: (1, TB) f32. wmid_ref: (2, H, H) bf16. sp_ref: (H, 8) f32. o_ref: (1, TB) f32."""
    x = x_ref[...]                       # (1, TB)  batch on lanes

    w1 = sp_ref[:, 0:1]                  # (H, 1)  == PyTorch W1 (out=H, in=1)
    b1 = sp_ref[:, 1:2]                  # (H, 1)
    b2 = sp_ref[:, 2:3]                  # (H, 1)
    b3 = sp_ref[:, 3:4]                  # (H, 1)
    w4 = sp_ref[:, 4:5]                  # (H, 1)  == PyTorch W4.T (out=1, in=H)
    b4 = sp_ref[0:1, 5:6]                # (1, 1)

    # Layer 1: K=1 "matmul" is an outer product -> VPU broadcast multiply (f32).
    h = jnp.maximum(w1 * x + b1, 0.0)                                     # (H, TB) f32

    # Layers 2 & 3: square H x H layers on the MXU, bf16 operands / f32 accumulate
    # (native PyTorch (out, in) weight layout: h_next = W @ h + b).
    h = jnp.maximum(
        jnp.dot(wmid_ref[0], h.astype(jnp.bfloat16),
                preferred_element_type=jnp.float32) + b2, 0.0)
    h = jnp.maximum(
        jnp.dot(wmid_ref[1], h.astype(jnp.bfloat16),
                preferred_element_type=jnp.float32) + b3, 0.0)

    # Layer 4: N=1 "matmul" -> VPU multiply + XLU sublane reduce (f32).
    y = jnp.sum(h * w4, axis=0, keepdims=True) + b4                       # (1, TB)
    o_ref[...] = y.astype(o_ref.dtype)                                    # lane-dense store


def net_forward(x, packed, *, tile_b=None):
    """x: (B, 1) float32.  packed: {'wmid': (2,H,H) bf16, 'sp': (H,8) f32}.  Returns (B, 1)."""
    B = x.shape[0]
    wmid, sp = packed["wmid"], packed["sp"]
    H = wmid.shape[-1]

    # Batch tile: per-grid-step overhead dominates at this size, so use the
    # biggest tile that fits.  For B <= 2048 collapse to a single grid step
    # (one big step beats two tiny overhead-bound steps, even on v7x's two
    # TensorCores); beyond that, 512-lane tiles keep the (H, tile_b) f32
    # intermediates out of vreg-spill territory and give v7x parallel steps.
    if tile_b is None:
        b_padded = pl.cdiv(B, 128) * 128
        tile_b = b_padded if b_padded <= 2048 else 512

    n_tiles = pl.cdiv(B, tile_b)
    Bp = n_tiles * tile_b

    # Lane-dense layout: (B,1)->(1,B) is a pure reshape; pad lanes to a tile multiple.
    xt = x.reshape(1, B)
    if Bp != B:
        xt = jnp.pad(xt, ((0, 0), (0, Bp - B)))

    flops = 2 * B * (2 * H * H + 2 * H)
    bytes_accessed = 2 * Bp * 4 + wmid.size * wmid.dtype.itemsize + sp.size * 4

    # Scoped-VMEM budget: single-buffered weights + double-buffered x/out tiles
    # + live (H, tile_b) f32 intermediates, with 2x headroom (v5e's default
    # scoped VMEM is only 16 MiB, so scaled configurations need this raised).
    vmem_bytes = (wmid.size * wmid.dtype.itemsize + sp.size * 4
                  + 2 * 2 * (tile_b * 4)
                  + 6 * H * tile_b * 4)
    vmem_limit = int(min(max(2 * vmem_bytes, 32 << 20), 100 << 20))

    out_t = pl.pallas_call(
        mlp_kernel,
        out_shape=jax.ShapeDtypeStruct((1, Bp), jnp.float32),
        grid=(n_tiles,),
        in_specs=[
            pl.BlockSpec((1, tile_b), lambda i: (0, i)),        # per-step batch tile
            pl.BlockSpec((2, H, H), lambda i: (0, 0, 0),        # grid-invariant weights:
                         pipeline_mode=pl.Buffered(1)),         #   fetched once, single-buffered
            pl.BlockSpec((H, 8), lambda i: (0, 0),
                         pipeline_mode=pl.Buffered(1)),
        ],
        out_specs=pl.BlockSpec((1, tile_b), lambda i: (0, i)),  # lane-dense output
        compiler_params=pltpu.CompilerParams(
            dimension_semantics=("parallel",),                  # megacore over batch (v7x)
            vmem_limit_bytes=vmem_limit),
        cost_estimate=pl.CostEstimate(
            flops=flops, transcendentals=0, bytes_accessed=bytes_accessed),
    )(xt, wmid, sp)

    return out_t[:, :B].reshape(B, 1)


def init_params(key, neural_num):
    """nn.Linear-style init: weight (out, in), bias (out,), U(-1/sqrt(in), 1/sqrt(in))."""
    H = neural_num
    ks = jax.random.split(key, 8)

    def uni(k, shape, fan_in):
        bound = 1.0 / jnp.sqrt(jnp.float32(fan_in))
        return jax.random.uniform(k, shape, jnp.float32, -bound, bound)

    return {
        "W1": uni(ks[0], (H, 1), 1), "b1": uni(ks[1], (H,), 1),
        "W2": uni(ks[2], (H, H), H), "b2": uni(ks[3], (H,), H),
        "W3": uni(ks[4], (H, H), H), "b3": uni(ks[5], (H,), H),
        "W4": uni(ks[6], (1, H), H), "b4": uni(ks[7], (1,), H),
    }


def pack_params(p):
    """Pack PyTorch-layout params into the kernel's two weight operands."""
    H = p["W2"].shape[0]
    # MXU operands in bf16 (halves DMA + VMEM residency); small/VPU params stay f32.
    wmid = jnp.stack([p["W2"], p["W3"]]).astype(jnp.bfloat16)   # (2, H, H), native (out, in)
    sp = jnp.zeros((H, 8), jnp.float32)
    sp = sp.at[:, 0].set(p["W1"][:, 0])                         # w1 column
    sp = sp.at[:, 1].set(p["b1"])
    sp = sp.at[:, 2].set(p["b2"])
    sp = sp.at[:, 3].set(p["b3"])
    sp = sp.at[:, 4].set(p["W4"][0, :])                         # w4 as a column
    sp = sp.at[:, 5].set(jnp.full((H,), p["b4"][0], jnp.float32))
    return {"wmid": wmid, "sp": sp}


def net_forward_ref(x, p):
    """Pure-JAX f32 reference matching PyTorch Net.forward exactly (y = x @ W.T + b)."""
    h = jnp.maximum(x @ p["W1"].T + p["b1"], 0.0)
    h = jnp.maximum(h @ p["W2"].T + p["b2"], 0.0)
    h = jnp.maximum(h @ p["W3"].T + p["b3"], 0.0)
    return h @ p["W4"].T + p["b4"]


if __name__ == "__main__":
    key = jax.random.PRNGKey(0)
    k_x, k_p = jax.random.split(key)

    neural_num = 32     # hidden width (Net(neural_num))
    batch = 256         # fits one 256-lane batch tile -> single grid step

    x = jax.random.normal(k_x, (batch, 1), jnp.float32)
    params = init_params(k_p, neural_num)
    packed = pack_params(params)

    out = net_forward(x, packed)
    out = jax.block_until_ready(out)

    ref = net_forward_ref(x, params)
    assert out.shape == (batch, 1), out.shape
    # bf16 MXU weights vs the pure-f32 reference -> loosened tolerance.
    assert jnp.allclose(out, ref, atol=2e-2, rtol=2e-2), (
        float(jnp.max(jnp.abs(out - ref))))

    print("KERNEL_OK")
</pallas_src>

<mosaic_0001>
module attributes {stable_mosaic.version = 11 : i64} {
  func.func @mlp_kernel(%arg0: i32, %arg1: memref<1x256xf32, #tpu.memory_space<vmem>>, %arg2: memref<2x32x32xbf16, #tpu.memory_space<vmem>>, %arg3: memref<32x8xf32, #tpu.memory_space<vmem>>, %arg4: memref<1x256xf32, #tpu.memory_space<vmem>>) attributes {dimension_semantics = [#tpu.dimension_semantics<parallel>], iteration_bounds = array<i64: 1>, scalar_prefetch = 0 : i64, scratch_operands = 0 : i64, tpu.core_type = #tpu.core_type<tc>, window_params = [{transform_indices = @transform_0, window_bounds = array<i64: 1, 256>}, {pipeline_mode = #tpu.pipeline_mode<synchronous>, transform_indices = @transform_1, window_bounds = array<i64: 2, 32, 32>}, {pipeline_mode = #tpu.pipeline_mode<synchronous>, transform_indices = @transform_2, window_bounds = array<i64: 32, 8>}, {transform_indices = @transform_3, window_bounds = array<i64: 1, 256>}]} {
    %c0 = arith.constant 0 : index
    %c0_0 = arith.constant 0 : index
    %0 = vector.load %arg1[%c0, %c0_0] : memref<1x256xf32, #tpu.memory_space<vmem>>, vector<1x256xf32>
    %c0_1 = arith.constant 0 : index
    %c0_2 = arith.constant 0 : index
    %1 = vector.load %arg3[%c0_1, %c0_2] : memref<32x8xf32, #tpu.memory_space<vmem>>, vector<32x1xf32>
    %c0_3 = arith.constant 0 : index
    %c1 = arith.constant 1 : index
    %2 = vector.load %arg3[%c0_3, %c1] : memref<32x8xf32, #tpu.memory_space<vmem>>, vector<32x1xf32>
    %c0_4 = arith.constant 0 : index
    %c2 = arith.constant 2 : index
    %3 = vector.load %arg3[%c0_4, %c2] : memref<32x8xf32, #tpu.memory_space<vmem>>, vector<32x1xf32>
    %c0_5 = arith.constant 0 : index
    %c3 = arith.constant 3 : index
    %4 = vector.load %arg3[%c0_5, %c3] : memref<32x8xf32, #tpu.memory_space<vmem>>, vector<32x1xf32>
    %c0_6 = arith.constant 0 : index
    %c4 = arith.constant 4 : index
    %5 = vector.load %arg3[%c0_6, %c4] : memref<32x8xf32, #tpu.memory_space<vmem>>, vector<32x1xf32>
    %c0_7 = arith.constant 0 : index
    %c5 = arith.constant 5 : index
    %6 = vector.load %arg3[%c0_7, %c5] : memref<32x8xf32, #tpu.memory_space<vmem>>, vector<1x1xf32>
    %7 = vector.broadcast %1 : vector<32x1xf32> to vector<32x256xf32>
    %8 = vector.broadcast %0 : vector<1x256xf32> to vector<32x256xf32>
    %9 = arith.mulf %7, %8 : vector<32x256xf32>
    %10 = vector.broadcast %2 : vector<32x1xf32> to vector<32x256xf32>
    %11 = arith.addf %9, %10 : vector<32x256xf32>
    %cst = arith.constant 0.000000e+00 : f32
    %12 = vector.broadcast %cst : f32 to vector<32x256xf32>
    %13 = arith.maximumf %11, %12 : vector<32x256xf32>
    %c0_8 = arith.constant 0 : index
    %c0_9 = arith.constant 0 : index
    %c0_10 = arith.constant 0 : index
    %14 = vector.load %arg2[%c0_8, %c0_9, %c0_10] : memref<2x32x32xbf16, #tpu.memory_space<vmem>>, vector<1x32x32xbf16>
    %15 = vector.shape_cast %14 : vector<1x32x32xbf16> to vector<32x32xbf16>
    %16 = arith.truncf %13 : vector<32x256xf32> to vector<32x256xbf16>
    %cst_11 = arith.constant dense<0.000000e+00> : vector<32x256xf32>
    %17 = tpu.matmul %15, %16, %cst_11 {dimension_numbers = #tpu.dot_dimension_numbers<[1], [0], [0], [1], [0, 0, 1, 1], [], []>} : vector<32x32xbf16>, vector<32x256xbf16>, vector<32x256xf32> -> vector<32x256xf32>
    %18 = vector.broadcast %3 : vector<32x1xf32> to vector<32x256xf32>
    %19 = arith.addf %17, %18 : vector<32x256xf32>
    %cst_12 = arith.constant 0.000000e+00 : f32
    %20 = vector.broadcast %cst_12 : f32 to vector<32x256xf32>
    %21 = arith.maximumf %19, %20 : vector<32x256xf32>
    %c1_13 = arith.constant 1 : index
    %c0_14 = arith.constant 0 : index
    %c0_15 = arith.constant 0 : index
    %22 = vector.load %arg2[%c1_13, %c0_14, %c0_15] : memref<2x32x32xbf16, #tpu.memory_space<vmem>>, vector<1x32x32xbf16>
    %23 = vector.shape_cast %22 : vector<1x32x32xbf16> to vector<32x32xbf16>
    %24 = arith.truncf %21 : vector<32x256xf32> to vector<32x256xbf16>
    %cst_16 = arith.constant dense<0.000000e+00> : vector<32x256xf32>
    %25 = tpu.matmul %23, %24, %cst_16 {dimension_numbers = #tpu.dot_dimension_numbers<[1], [0], [0], [1], [0, 0, 1, 1], [], []>} : vector<32x32xbf16>, vector<32x256xbf16>, vector<32x256xf32> -> vector<32x256xf32>
    %26 = vector.broadcast %4 : vector<32x1xf32> to vector<32x256xf32>
    %27 = arith.addf %25, %26 : vector<32x256xf32>
    %cst_17 = arith.constant 0.000000e+00 : f32
    %28 = vector.broadcast %cst_17 : f32 to vector<32x256xf32>
    %29 = arith.maximumf %27, %28 : vector<32x256xf32>
    %30 = vector.broadcast %5 : vector<32x1xf32> to vector<32x256xf32>
    %31 = arith.mulf %29, %30 : vector<32x256xf32>
    %cst_18 = arith.constant dense<0.000000e+00> : vector<256xf32>
    %32 = vector.multi_reduction <add>, %31, %cst_18 [0] : vector<32x256xf32> to vector<256xf32>
    %33 = vector.shape_cast %32 : vector<256xf32> to vector<1x256xf32>
    %34 = vector.broadcast %6 : vector<1x1xf32> to vector<1x256xf32>
    %35 = arith.addf %33, %34 : vector<1x256xf32>
    %c0_19 = arith.constant 0 : index
    %c0_20 = arith.constant 0 : index
    %36 = vector.load %arg4[%c0_19, %c0_20] : memref<1x256xf32, #tpu.memory_space<vmem>>, vector<1x256xf32>
    tpu.vector_store %arg4[%c0_19, %c0_20], %35 {strides = array<i32>} : memref<1x256xf32, #tpu.memory_space<vmem>>, vector<1x256xf32>,
    return
  }
  func.func @transform_0(%arg0: i32) -> (i32, i32) {
    %c0_i32 = arith.constant 0 : i32
    %c0_i32_0 = arith.constant 0 : i32
    return %c0_i32, %arg0 : i32, i32
  }
  func.func @transform_1(%arg0: i32) -> (i32, i32, i32) {
    %c0_i32 = arith.constant 0 : i32
    %c0_i32_0 = arith.constant 0 : i32
    %c0_i32_1 = arith.constant 0 : i32
    %c0_i32_2 = arith.constant 0 : i32
    return %c0_i32, %c0_i32_0, %c0_i32_1 : i32, i32, i32
  }
  func.func @transform_2(%arg0: i32) -> (i32, i32) {
    %c0_i32 = arith.constant 0 : i32
    %c0_i32_0 = arith.constant 0 : i32
    %c0_i32_1 = arith.constant 0 : i32
    return %c0_i32, %c0_i32_0 : i32, i32
  }
  func.func @transform_3(%arg0: i32) -> (i32, i32) {
    %c0_i32 = arith.constant 0 : i32
    %c0_i32_0 = arith.constant 0 : i32
    return %c0_i32, %arg0 : i32, i32
  }
}

</mosaic_0001>

<bundles_post_ra>
// kernel: tpu_custom_call.1
= control target key start
LH: loop header
LB: loop body
LE: loop exit
PB: predicated region body
PF: predicated region fallthrough
CT: control target
= control target key end

     0   :  { %v443_v1 = vmov 1   ;;  %v444_v2 = vmov 0   ;;  %s558_s0 = inlined_call_operand.vmem [shape: f32[1,256], index: 0, kind: input, shape index: {}]   ;;  %s559_s1 = inlined_call_operand.vmem [shape: bf16[2,32,32], index: 1, kind: input, shape index: {}]   ;;  %s560_s2 = inlined_call_operand.vmem [shape: f32[32,8], index: 2, kind: input, shape index: {}]   ;;  %s561_s3 = inlined_call_operand.hbm [shape: f32[1,256], index: 3, kind: output, shape index: {}]  }
   0x1   :  { %v474_v0 = vld [vmem:[%s560_s2] sm:$0xff]  ;;  %404 = vset.pattern.permute.xlu1 %v443_v1  ;;  %403 = vset.pattern.permute.xlu0 %v444_v2  ;;  %v482_v3 = vld [vmem:[%s560_s2 + $0x8] sm:$0xff] }
   0x2   :  { %62 = vperm.xlu1 %404, %v474_v0   ;;  %24 = vperm.xlu0 %403, %v474_v0  }
   0x3   :  { %166 = vmatprep.mubr.bf16.mxu0 %v444_v2  ;;  %268 = vmatprep.mubr.bf16.mxu1 %v444_v2 }
   0x4   :  { %8 = vsyncpa [#allocation3], 0  ;;  %v491_v4 = vld [vmem:[%s560_s2 + $0x10] sm:$0xff]  ;;  %v496_v5 = vld [vmem:[%s560_s2 + $0x18] sm:$0xff]  ;;  %v445_v6 = vmov 2   ;;  %v43_v7 = vlaneseq  ;;  %vm127_vm0 = vcmask 261120  }
   0x5   :  { %v16_v11 = vld [vmem:[%s558_s0] sm:$0x3]  ;;  %v416_v51 = vld [vmem:[%s559_s1 + $0x8] sm:$0xff]   ;;  %v446_v52 = vmov 3   ;;  %v447_v53 = vmov 4   ;;  %v448_v55 = vmov 5  }
   0x6   :  { %66 = vperm.xlu1 %404, %v482_v3   ;;  %29 = vperm.xlu0 %403, %v482_v3   ;;  %v508_v8 = vshrl.u32 %v43_v7, 7  ;;  %v415_v50 = vld [vmem:[%s559_s1] sm:$0xff]   ;;  %vm366_vm1 = vcmp.lt.s32.totalorder %v43_v7, 256 }
   0x7   :  { %v21_v54 = vld [vmem:[%s560_s2] sm:$0x1] }
   0x8   :  { %v45_v9 = vsub.s32 0, %v508_v8  ;;  %v49_v10 = vsub.s32 1, %v508_v8 }
   0xa   :  { %405 = vset.pattern.permute.xlu1 %v444_v2  ;;  %34 = vperm.xlu0 %403, %v491_v4   ;;  %v46_v12 = vrot.slane %v16_v11, %v45_v9  ;;  %v50_v13 = vrot.slane %v16_v11, %v49_v10 }
   0xb   :  { %39 = vperm.xlu1 %405, %v496_v5  }
   0xe   :  { %406 = vset.pattern.permute.xlu0 %v443_v1 }
   0xf   :  { %407 = vset.pattern.permute.xlu1 %v443_v1  ;;  %70 = vperm.xlu0 %406, %v491_v4  }
  0x10   :  { %74 = vperm.xlu1 %407, %v496_v5  }
  0x13   :  { %409 = vset.pattern.permute.xlu0 %v445_v6 }
  0x14   :  { %408 = vset.pattern.permute.xlu1 %v445_v6  ;;  %106 = vperm.xlu0 %409, %v482_v3  }
  0x15   :  { %102 = vperm.xlu1 %408, %v474_v0  }
  0x18   :  { %410 = vset.pattern.permute.xlu0 %v446_v52 }
  0x19   :  { %110 = vperm.xlu1 %408, %v491_v4   ;;  %205 = vperm.xlu0 %410, %v474_v0  }
  0x1d   :  { %114 = vperm.xlu1 %408, %v496_v5   ;;  %217 = vperm.xlu0 %410, %v496_v5  }
  0x21   :  { %411 = vset.pattern.permute.xlu1 %v446_v52  ;;  %413 = vset.pattern.permute.xlu0 %v447_v53 }
  0x22   :  { %209 = vperm.xlu1 %411, %v482_v3   ;;  %302 = vperm.xlu0 %413, %v482_v3  }
  0x26   :  { %213 = vperm.xlu1 %411, %v491_v4   ;;  %414 = vset.pattern.permute.xlu0 %v448_v55 }
  0x27   :  { %341 = vperm.xlu0 %414, %v21_v54  }
  0x2a   :  { %412 = vset.pattern.permute.xlu1 %v447_v53 }
  0x2b   :  { %298 = vperm.xlu1 %412, %v474_v0  }
  0x2f   :  { %306 = vperm.xlu1 %412, %v491_v4  }
  0x33   :  { %310 = vperm.xlu1 %412, %v496_v5  }
  0x81   :  { %v63_v14 = vpop.permute.xlu1 %62  ;;  %v25_v15 = vpop.permute.xlu0 %24 }
  0x82   :  { %v53_v16 = vmul.f32 %v46_v12, %v25_v15  ;;  %v54_v17 = vmul.f32 %v50_v13, %v25_v15 }
  0x84   :  { %v77_v20 = vadd.f32 %v63_v14, %v53_v16  ;;  %v78_v23 = vadd.f32 %v63_v14, %v54_v17 }
  0x85   :  { %v67_v18 = vpop.permute.xlu1 %66  ;;  %v30_v19 = vpop.permute.xlu0 %29 }
  0x86   :  { %v55_v21 = vmul.f32 %v46_v12, %v30_v19  ;;  %v56_v22 = vmul.f32 %v50_v13, %v30_v19  ;;  %v86_v28 = vmax.f32 %v78_v23, 0.0  ;;  %v85_v30 = vmax.f32 %v77_v20, 0.0 }
  0x88   :  { %v79_v24 = vadd.f32 %v67_v18, %v55_v21  ;;  %v80_v25 = vadd.f32 %v67_v18, %v56_v22 }
  0x89   :  { %v35_v26 = vpop.permute.xlu0 %34 }
  0x8a   :  { %v40_v27 = vpop.permute.xlu1 %39  ;;  %v88_v29 = vmax.f32 %v80_v25, 0.0  ;;  %v87_v31 = vmax.f32 %v79_v24, 0.0  ;;  %v57_v34 = vmul.f32 %v46_v12, %v35_v26  ;;  %v58_v35 = vmul.f32 %v50_v13, %v35_v26 }
  0x8b   :  { %v59_v36 = vmul.f32 %v46_v12, %v40_v27  ;;  %v60_v37 = vmul.f32 %v50_v13, %v40_v27  ;;  %v417_v27 = vld [vmem:[%s559_s1 + $0x10] sm:$0xff]  }
  0x8c   :  { %v98_v32 = vpack.c.bf16 %v88_v29, %v86_v28  ;;  %v97_v33 = vpack.c.bf16 %v87_v31, %v85_v30  ;;  %v418_v28 = vld [vmem:[%s559_s1 + $0x18] sm:$0xff]   ;;  %s450_s1 = smov [#allocation2]  }
  0x8d   :  { %s375_s30 = sshll.u32 %s450_s1, 4  ;;  %s376_s30 = int_to_ptr.vmem [resolvable:$true] %s375_s30 }
  0x8e   :  { %v71_v38 = vpop.permute.xlu0 %70  ;;  %134 = vmatprep.subr.bf16.mxu0 %v98_v32  ;;  %s419_s4 = scalar_lea.vmem %s376_s30, 32  ;;  %p424_p1 = scmp.lt.s32.totalorder %s376_s30, %s376_s30 }
  0x8f   :  { %v81_v39 = vadd.f32 %v71_v38, %v57_v34  ;;  %v82_v40 = vadd.f32 %v71_v38, %v58_v35  ;;  %v75_v41 = vpop.permute.xlu1 %74  ;;  %135 = vmatpush1.bf16.msra.mxu0 %v97_v33  ;;  %p420_p0 = scmp.ne.s32.totalorder %s376_s30, %s419_s4  ;;  %p425_p2 = scmp.lt.s32.totalorder %s419_s4, %s419_s4 }
  0x90   :  { %v83_v42 = vadd.f32 %v75_v41, %v59_v36  ;;  %v84_v43 = vadd.f32 %v75_v41, %v60_v37 }
  0x91   :  { %v89_v44 = vmax.f32 %v81_v39, 0.0  ;;  %v90_v45 = vmax.f32 %v82_v40, 0.0  ;;  %p426_p3 = por %p425_p2, %p424_p1 }
  0x92   :  { %v91_v46 = vmax.f32 %v83_v42, 0.0  ;;  %v92_v47 = vmax.f32 %v84_v43, 0.0 }
  0x93   :  { %v107_v58 = vpop.permute.xlu0 %106  ;;  %p427_p4 = pnand %p426_p3, %p420_p0 }
  0x94   :  { %v100_v48 = vpack.c.bf16 %v92_v47, %v90_v45  ;;  %v99_v49 = vpack.c.bf16 %v91_v46, %v89_v44  ;;  %v103_v56 = vpop.permute.xlu1 %102 }
  0x96   :  { %136 = vmatprep.subr.bf16.mxu0 %v100_v48 }
  0x97   :  { %137 = vmatpush1.bf16.msra.mxu0 %v99_v49 }
  0x98   :  { %v111_v1 = vpop.permute.xlu1 %110  ;;  %v206_v30 = vpop.permute.xlu0 %205 }
  0x9a   :  { %385 = vmatmul.mubr.msk.bf16.vlgmr.msra.gmra.mrb[0].mxu0 %vm127_vm0, %v415_v50 }
  0x9b   :  { %176 = vmatprep.mubr.bf16.mxu0 %v444_v2 }
  0x9c   :  { %v115_v15 = vpop.permute.xlu1 %114  ;;  %v218_v32 = vpop.permute.xlu0 %217 }
  0xa1   :  { %v210_v29 = vpop.permute.xlu1 %209  ;;  %v303_v43 = vpop.permute.xlu0 %302 }
  0xa2   :  { %386 = vmatmul.mubr.msk.bf16.gmra.mrb[4].mxu0 %vm127_vm0, %v416_v51 }
  0xa5   :  { %v214_v31 = vpop.permute.xlu1 %213 }
  0xaa   :  { %v299_v36 = vpop.permute.xlu1 %298 }
  0xae   :  { %v307_v49 = vpop.permute.xlu1 %306 }
 0x16d   :  { %v168_v57 = vpop.f32.mrb[0].mxu0 }
 0x16e   :  { %v169_v59 = vadd.f32 %v168_v57, %v103_v56  ;;  %v170_v60 = vpop.f32.mrb[1].mxu0 }
 0x16f   :  { %v171_v61 = vadd.f32 %v170_v60, %v103_v56  ;;  %v172_v62 = vpop.f32.mrb[2].mxu0 }
 0x170   :  { %v173_v63 = vadd.f32 %v172_v62, %v107_v58  ;;  %v174_v0 = vpop.f32.mrb[3].mxu0  ;;  %v187_v6 = vmax.f32 %v169_v59, 0.0 }
 0x171   :  { %v175_v3 = vadd.f32 %v174_v0, %v107_v58  ;;  %v188_v10 = vmax.f32 %v171_v61, 0.0 }
 0x172   :  { %v189_v9 = vmax.f32 %v173_v63, 0.0 }
 0x173   :  { %v190_v4 = vmax.f32 %v175_v3, 0.0 }
 0x174   :  { %v200_v11 = vpack.c.bf16 %v189_v9, %v187_v6 }
 0x175   :  { %v178_v12 = vpop.f32.mrb[4].mxu0  ;;  %v201_v13 = vpack.c.bf16 %v190_v4, %v188_v10 }
 0x176   :  { %v179_v14 = vadd.f32 %v178_v12, %v111_v1  ;;  %v180_v5 = vpop.f32.mrb[5].mxu0 }
 0x177   :  { %v181_v16 = vadd.f32 %v180_v5, %v111_v1  ;;  %v182_v17 = vpop.f32.mrb[6].mxu0  ;;  %236 = vmatprep.subr.bf16.mxu1 %v201_v13  ;;  %v311_v1 = vpop.permute.xlu1 %310 }
 0x178   :  { %v183_v18 = vadd.f32 %v182_v17, %v115_v15  ;;  %v184_v19 = vpop.f32.mrb[7].mxu0  ;;  %237 = vmatpush1.bf16.msra.mxu1 %v200_v11  ;;  %v191_v21 = vmax.f32 %v179_v14, 0.0 }
 0x179   :  { %v185_v20 = vadd.f32 %v184_v19, %v115_v15  ;;  %v192_v23 = vmax.f32 %v181_v16, 0.0 }
 0x17a   :  { %v193_v22 = vmax.f32 %v183_v18, 0.0  ;;  %v449_v18 = vmov 1966171168  }
 0x17b   :  { %v194_v24 = vmax.f32 %v185_v20, 0.0  ;;  %v350_v19 = vunpack.c.l.s4 %v449_v18 }
 0x17c   :  { %v202_v25 = vpack.c.bf16 %v193_v22, %v191_v21 }
 0x17d   :  { %v203_v26 = vpack.c.bf16 %v194_v24, %v192_v23  ;;  %v351_v24 = vunpack.c.0.s8 %v350_v19 }
 0x17f   :  { %238 = vmatprep.subr.bf16.mxu1 %v203_v26 }
 0x180   :  { %239 = vmatpush1.bf16.msra.mxu1 %v202_v25  ;;  %v342_v25 = vpop.permute.xlu0 %341 }
 0x183   :  { %393 = vmatmul.mubr.msk.bf16.vlgmr.msra.gmra.mrb[0].mxu1 %vm127_vm0, %v417_v27 }
 0x184   :  { %278 = vmatprep.mubr.bf16.mxu1 %v444_v2 }
 0x18b   :  { %394 = vmatmul.mubr.msk.bf16.gmra.mrb[4].mxu1 %vm127_vm0, %v418_v28 }
 0x256   :  { %v270_v33 = vpop.f32.mrb[0].mxu1 }
 0x257   :  { %v271_v34 = vadd.f32 %v270_v33, %v206_v30  ;;  %v272_v35 = vpop.f32.mrb[1].mxu1 }
 0x258   :  { %v273_v37 = vadd.f32 %v272_v35, %v206_v30  ;;  %v274_v38 = vpop.f32.mrb[2].mxu1  ;;  %v354_v30 = vsub.s32 %v351_v24, %v508_v8 }
 0x259   :  { %v289_v39 = vmax.f32 %v271_v34, 0.0  ;;  %v275_v40 = vadd.f32 %v274_v38, %v210_v29  ;;  %v276_v41 = vpop.f32.mrb[3].mxu1 }
 0x25a   :  { %v290_v2 = vmax.f32 %v273_v37, 0.0  ;;  %v277_v42 = vadd.f32 %v276_v41, %v210_v29 }
 0x25b   :  { %v291_v44 = vmax.f32 %v275_v40, 0.0  ;;  %v313_v46 = vmul.f32 %v299_v36, %v289_v39 }
 0x25c   :  { %v292_v45 = vmax.f32 %v277_v42, 0.0  ;;  %v314_v48 = vmul.f32 %v299_v36, %v290_v2 }
 0x25d   :  { %v315_v47 = vmul.f32 %v303_v43, %v291_v44 }
 0x25e   :  { %v316_v50 = vmul.f32 %v303_v43, %v292_v45  ;;  %v280_v51 = vpop.f32.mrb[4].mxu1 }
 0x25f   :  { %v321_v52 = vadd.f32 %v315_v47, %v313_v46  ;;  %v281_v53 = vadd.f32 %v280_v51, %v214_v31  ;;  %v282_v54 = vpop.f32.mrb[5].mxu1 }
 0x260   :  { %v330_v55 = vadd.f32 %v316_v50, %v314_v48  ;;  %v283_v56 = vadd.f32 %v282_v54, %v214_v31  ;;  %v284_v57 = vpop.f32.mrb[6].mxu1 }
 0x261   :  { %v293_v58 = vmax.f32 %v281_v53, 0.0  ;;  %v285_v59 = vadd.f32 %v284_v57, %v218_v32  ;;  %v286_v60 = vpop.f32.mrb[7].mxu1 }
 0x262   :  { %v294_v61 = vmax.f32 %v283_v56, 0.0  ;;  %v287_v62 = vadd.f32 %v286_v60, %v218_v32 }
 0x263   :  { %v317_v63 = vmul.f32 %v307_v49, %v293_v58  ;;  %v295_v0 = vmax.f32 %v285_v59, 0.0 }
 0x264   :  { %v318_v3 = vmul.f32 %v307_v49, %v294_v61  ;;  %v296_v6 = vmax.f32 %v287_v62, 0.0 }
 0x265   :  { %v322_v9 = vadd.f32 %v321_v52, %v317_v63  ;;  %v319_v10 = vmul.f32 %v311_v1, %v295_v0 }
 0x266   :  { %v331_v4 = vadd.f32 %v330_v55, %v318_v3  ;;  %v320_v11 = vmul.f32 %v311_v1, %v296_v6 }
 0x267   :  { %v323_v12 = vadd.f32 %v322_v9, %v319_v10 }
 0x268   :  { %v332_v13 = vadd.f32 %v331_v4, %v320_v11 }
 0x269   :  { %v324_v14 = vrot.slane %v323_v12, 4 }
 0x26a   :  { %v333_v5 = vrot.slane %v332_v13, 4 }
 0x26b   :  { %v325_v15 = vadd.f32 %v324_v14, %v323_v12 }
 0x26c   :  { %v334_v16 = vadd.f32 %v333_v5, %v332_v13 }
 0x26d   :  { %v326_v17 = vrot.slane %v325_v15, 2 }
 0x26e   :  { %v335_v20 = vrot.slane %v334_v16, 2 }
 0x26f   :  { %v327_v21 = vadd.f32 %v326_v17, %v325_v15 }
 0x270   :  { %v336_v22 = vadd.f32 %v335_v20, %v334_v16 }
 0x271   :  { %v328_v23 = vrot.slane %v327_v21, 1 }
 0x272   :  { %v337_v26 = vrot.slane %v336_v22, 1 }
 0x273   :  { %v329_v27 = vadd.f32 %v328_v23, %v327_v21 }
 0x274   :  { %v338_v28 = vadd.f32 %v337_v26, %v336_v22 }
 0x275   :  { %v344_v29 = vadd.f32 %v342_v25, %v329_v27 }
 0x276   :  { %v345_v31 = vadd.f32 %v342_v25, %v338_v28 }
 0x278   :  { %v348_v32 = vcombine.low %v344_v29, %v345_v31 }
 0x27a   :  { %v355_v33 = vrot.slane %v348_v32, %v354_v30 }
 0x27c   :  { %v362_v34 = vrot.slane %v355_v33, %v354_v30 }
 0x27e   :  { %368 = vst.msk [vmem:[#allocation2] sm:$0x3] %vm366_vm1, %v362_v34 }
 0x27f   :  { %430 = shalt.err (!%p427_p4)
}
 0x280   :  { %s431_s7 = scalar_lea.hbm %s561_s3, 32 }
 0x281   :  { %p432_p5 = scmp.ne.s32.totalorder %s561_s3, %s431_s7  ;;  %p435_p6 = scmp.lt.u32.totalorder %s431_s7, %s561_s3 }
 0x283   :  { %p437_p7 = pnand %p435_p6, %p432_p5 }
 0x285   :  { %440 = shalt.err (!%p437_p7)
}
 0x286   :  { %378 = dma.vmem_to_hbm [thread:$0]  %s376_s30, 32, %s561_s3, [#allocation3]  }
 0x287   :  { %441 = dma.done.wait [#allocation3], 32  }
 0x288   :  { %442 = vsyncadd [#allocation3], 4294967264 }
 0x289   :  { %382 = vsyncpa [#allocation3], 1 }

</bundles_post_ra>
